<compile_context>
chip_gen: v6e
topology: v6e:2x2x1
jax: 0.10.0
libtpu: 0.0.40
codegen_flags: <defaults>
</compile_context>

<pallas_src>
import functools
import math

import jax
import jax.numpy as jnp
from jax.experimental import pallas as pl
from jax.experimental.pallas import tpu as pltpu


# ----------------------------- Pallas kernels ------------------------------ #
def _train_split_kernel(nk, x_ref, wmu_ref, wsig_ref, ei_ref, eo_ref,
                        bmu_ref, bsig_ref, beps_ref, o_ref, *acc):
    """Small-batch algebraic path:
       y = x @ wmu_t + ((x * eps_in) @ wsig_t) * eps_out + (bmu + bsig*beps)."""
    wd = wmu_ref.dtype
    xs = x_ref[...]                                   # (tm, tk) f32
    xse = xs * ei_ref[...]                            # (tm,tk) * (1,tk)
    d_mu = jnp.dot(xs.astype(wd), wmu_ref[...],
                   preferred_element_type=jnp.float32)
    d_sig = jnp.dot(xse.astype(wd), wsig_ref[...],
                    preferred_element_type=jnp.float32)

    if nk == 1:
        b = bmu_ref[...] + bsig_ref[...] * beps_ref[...]
        o_ref[...] = (d_mu + d_sig * eo_ref[...] + b).astype(o_ref.dtype)
    else:
        accm_ref, accs_ref = acc
        k = pl.program_id(2)

        @pl.when(k == 0)
        def _():
            accm_ref[...] = jnp.zeros_like(accm_ref)
            accs_ref[...] = jnp.zeros_like(accs_ref)

        accm_ref[...] += d_mu
        accs_ref[...] += d_sig

        @pl.when(k == nk - 1)
        def _():
            b = bmu_ref[...] + bsig_ref[...] * beps_ref[...]
            o_ref[...] = (accm_ref[...] + accs_ref[...] * eo_ref[...] + b
                          ).astype(o_ref.dtype)


def _train_fused_kernel(nk, x_ref, wmu_ref, wsig_ref, ei_ref, eo_ref,
                        bmu_ref, bsig_ref, beps_ref, o_ref, *acc):
    """Large-batch path: rank-1 noise rebuilt on-chip, single dot per step."""
    wd = wmu_ref.dtype
    noise = (ei_ref[...] * eo_ref[...]).astype(wd)    # (tk,1)*(1,tn) outer
    w = wmu_ref[...] + wsig_ref[...] * noise          # (tk, tn)
    d = jnp.dot(x_ref[...].astype(wd), w, preferred_element_type=jnp.float32)

    if nk == 1:
        b = bmu_ref[...] + bsig_ref[...] * beps_ref[...]
        o_ref[...] = (d + b).astype(o_ref.dtype)
    else:
        (acc_ref,) = acc
        k = pl.program_id(2)

        @pl.when(k == 0)
        def _():
            acc_ref[...] = jnp.zeros_like(acc_ref)

        acc_ref[...] += d

        @pl.when(k == nk - 1)
        def _():
            b = bmu_ref[...] + bsig_ref[...] * beps_ref[...]
            o_ref[...] = (acc_ref[...] + b).astype(o_ref.dtype)


def _eval_kernel(nk, x_ref, wmu_ref, bmu_ref, o_ref, *acc):
    """Eval mode: only weight_mu / bias_mu are streamed."""
    wd = wmu_ref.dtype
    d = jnp.dot(x_ref[...].astype(wd), wmu_ref[...],
                preferred_element_type=jnp.float32)

    if nk == 1:
        o_ref[...] = (d + bmu_ref[...]).astype(o_ref.dtype)
    else:
        (acc_ref,) = acc
        k = pl.program_id(2)

        @pl.when(k == 0)
        def _():
            acc_ref[...] = jnp.zeros_like(acc_ref)

        acc_ref[...] += d

        @pl.when(k == nk - 1)
        def _():
            o_ref[...] = (acc_ref[...] + bmu_ref[...]).astype(o_ref.dtype)


# ----------------------------- tiling helpers ------------------------------ #
def _round_up(x, m):
    return ((x + m - 1) // m) * m


def _pick_tile(dim, cap, prefer_multi=False):
    """Pick a 128-multiple tile minimizing padding; tie-break toward >=2 blocks
    (feeds both v7x TensorCores) then toward the largest tile."""
    best_key, best = None, None
    for c in range(128, cap + 1, 128):
        padded = _round_up(dim, c)
        pad = padded - dim
        nblk = padded // c
        key = (pad, 0 if (not prefer_multi or nblk >= 2) else 1, -c)
        if best_key is None or key < best_key:
            best_key, best = key, (c, padded)
    return best  # (tile, padded_dim)


def _pick_tm(batch, cap=512):
    if batch <= cap:
        return _round_up(batch, 8)
    best_key, best = None, None
    for c in range(64, cap + 1, 64):
        key = (_round_up(batch, c) - batch, -c)
        if best_key is None or key < best_key:
            best_key, best = key, c
    return best


# ------------------------- one-time param preparation ----------------------- #
def prepare_noisy_linear_params(params, weight_dtype=jnp.float32,
                                tn_cap=512, tk_cap=1024):
    """Pad + transpose weights ONCE (not per forward call). Re-run only when the
    underlying parameters / noise buffers change."""
    out_f, in_f = params["weight_mu"].shape
    tn, Np = _pick_tile(out_f, tn_cap, prefer_multi=(out_f >= 256))
    tk, Kp = _pick_tile(in_f, tk_cap)

    def pad2(a, rows, cols):
        return jnp.pad(a, ((0, rows - a.shape[0]), (0, cols - a.shape[1])))

    ei = params["weight_eps_in"].astype(jnp.float32)
    eo = params["weight_eps_out"].astype(jnp.float32)

    return dict(
        in_features=in_f, out_features=out_f,
        tn=tn, tk=tk, Np=Np, Kp=Kp,
        # weights pre-transposed to (in, out) so the kernel dot is x @ w_t
        wmu_t=pad2(params["weight_mu"].T.astype(weight_dtype), Kp, Np),
        wsig_t=pad2(params["weight_sigma"].T.astype(weight_dtype), Kp, Np),
        eps_in_row=pad2(ei.reshape(1, -1), 1, Kp),
        eps_in_col=pad2(ei.reshape(-1, 1), Kp, 1),
        eps_out_row=pad2(eo.reshape(1, -1), 1, Np),
        bias_mu=pad2(params["bias_mu"].reshape(1, -1).astype(jnp.float32), 1, Np),
        bias_sigma=pad2(params["bias_sigma"].reshape(1, -1).astype(jnp.float32), 1, Np),
        bias_epsilon=pad2(params["bias_epsilon"].reshape(1, -1).astype(jnp.float32), 1, Np),
    )


# --------------------------------- forward ---------------------------------- #
def noisy_linear_forward(x, prepared, training=True):
    """x: (batch, in_features) f32.  `prepared` from prepare_noisy_linear_params."""
    batch, in_f = x.shape
    assert in_f == prepared["in_features"]
    out_f = prepared["out_features"]
    tn, tk, Np, Kp = prepared["tn"], prepared["tk"], prepared["Np"], prepared["Kp"]

    tm = _pick_tm(batch)
    Mp = _round_up(batch, tm)
    nk = Kp // tk
    grid = (Mp // tm, Np // tn, nk)          # reduction axis (K) last

    xp = x
    if Mp != batch or Kp != in_f:
        xp = jnp.pad(x, ((0, Mp - batch), (0, Kp - in_f)))

    x_spec = pl.BlockSpec((tm, tk), lambda i, j, k: (i, k))
    w_spec = pl.BlockSpec((tk, tn), lambda i, j, k: (k, j))
    nrow_spec = pl.BlockSpec((1, tn), lambda i, j, k: (0, j))
    out_spec = pl.BlockSpec((tm, tn), lambda i, j, k: (i, j))

    compiler_params = pltpu.CompilerParams(
        dimension_semantics=("parallel", "parallel", "arbitrary"),
        vmem_limit_bytes=40 * 1024 * 1024)

    if not training:
        kern = functools.partial(_eval_kernel, nk)
        scratch = [] if nk == 1 else [pltpu.VMEM((tm, tn), jnp.float32)]
        out_p = pl.pallas_call(
            kern,
            out_shape=jax.ShapeDtypeStruct((Mp, Np), x.dtype),
            grid_spec=pltpu.PrefetchScalarGridSpec(
                num_scalar_prefetch=0, grid=grid,
                in_specs=[x_spec, w_spec, nrow_spec],
                out_specs=out_spec,
                scratch_shapes=scratch),
            compiler_params=compiler_params,
        )(xp, prepared["wmu_t"], prepared["bias_mu"])
    else:
        split = tm <= 128  # small-batch algebraic path vs fused noise rebuild
        if split:
            kern = functools.partial(_train_split_kernel, nk)
            eps_in = prepared["eps_in_row"]
            ei_spec = pl.BlockSpec((1, tk), lambda i, j, k: (0, k))
            scratch = [] if nk == 1 else [pltpu.VMEM((tm, tn), jnp.float32)] * 2
        else:
            kern = functools.partial(_train_fused_kernel, nk)
            eps_in = prepared["eps_in_col"]
            ei_spec = pl.BlockSpec((tk, 1), lambda i, j, k: (k, 0))
            scratch = [] if nk == 1 else [pltpu.VMEM((tm, tn), jnp.float32)]

        out_p = pl.pallas_call(
            kern,
            out_shape=jax.ShapeDtypeStruct((Mp, Np), x.dtype),
            grid_spec=pltpu.PrefetchScalarGridSpec(
                num_scalar_prefetch=0, grid=grid,
                in_specs=[x_spec, w_spec, w_spec, ei_spec, nrow_spec,
                          nrow_spec, nrow_spec, nrow_spec],
                out_specs=out_spec,
                scratch_shapes=scratch),
            compiler_params=compiler_params,
        )(xp, prepared["wmu_t"], prepared["wsig_t"], eps_in,
          prepared["eps_out_row"], prepared["bias_mu"],
          prepared["bias_sigma"], prepared["bias_epsilon"])

    if Mp == batch and Np == out_f:
        return out_p
    return out_p[:batch, :out_f]


# ------------------------- deterministic param init ------------------------- #
def _scale_noise(key, size):
    g = jax.random.normal(key, (size,), dtype=jnp.float32)
    return jnp.sign(g) * jnp.sqrt(jnp.abs(g))


def init_noisy_linear(key, in_features, out_features, sigma_init=0.5):
    k_wmu, k_bmu, k_ein, k_eout = jax.random.split(key, 4)
    mu_range = 1.0 / math.sqrt(in_features)

    weight_mu = jax.random.uniform(
        k_wmu, (out_features, in_features), jnp.float32, -mu_range, mu_range)
    weight_sigma = jnp.full((out_features, in_features),
                            sigma_init / math.sqrt(in_features), jnp.float32)
    bias_mu = jax.random.uniform(
        k_bmu, (out_features,), jnp.float32, -mu_range, mu_range)
    bias_sigma = jnp.full((out_features,),
                          sigma_init / math.sqrt(out_features), jnp.float32)

    # Factored noise kept factored: weight_epsilon = outer(eps_out, eps_in)
    # is reconstructed on-chip (or folded algebraically), never materialized.
    eps_in = _scale_noise(k_ein, in_features)
    eps_out = _scale_noise(k_eout, out_features)

    return dict(weight_mu=weight_mu, weight_sigma=weight_sigma,
                weight_eps_in=eps_in, weight_eps_out=eps_out,
                bias_mu=bias_mu, bias_sigma=bias_sigma,
                bias_epsilon=eps_out)


# --------------------------------- reference -------------------------------- #
def noisy_linear_ref(x, p, training=True):
    if training:
        weight_epsilon = jnp.outer(p["weight_eps_out"], p["weight_eps_in"])
        w = p["weight_mu"] + p["weight_sigma"] * weight_epsilon
        b = p["bias_mu"] + p["bias_sigma"] * p["bias_epsilon"]
    else:
        w, b = p["weight_mu"], p["bias_mu"]
    return jnp.dot(x, w.T, precision=jax.lax.Precision.HIGHEST) + b


if __name__ == "__main__":
    key = jax.random.PRNGKey(0)
    kp1, kx1, kp2, kx2, kp3, kx3 = jax.random.split(key, 6)

    # --- A: DQN-head shapes -> split path, single K step (no scratch) -------
    pA = init_noisy_linear(kp1, 32, 16, sigma_init=0.5)
    prepA = prepare_noisy_linear_params(pA)              # pad/transpose ONCE
    xA = jax.random.normal(kx1, (8, 32), dtype=jnp.float32)

    yA = jax.block_until_ready(noisy_linear_forward(xA, prepA, training=True))
    assert yA.shape == (8, 16)
    assert jnp.allclose(yA, noisy_linear_ref(xA, pA, True),
                        atol=1e-5, rtol=1e-5), "A train mismatch"
    yAe = jax.block_until_ready(noisy_linear_forward(xA, prepA, training=False))
    assert jnp.allclose(yAe, noisy_linear_ref(xA, pA, False),
                        atol=1e-5, rtol=1e-5), "A eval mismatch"

    # --- B: multi-K split path + N padding (1536 -> tk=768, 272 -> tn=128) ---
    pB = init_noisy_linear(kp2, 1536, 272, sigma_init=0.5)
    prepB = prepare_noisy_linear_params(pB)
    xB = jax.random.normal(kx2, (24, 1536), dtype=jnp.float32)

    yB = jax.block_until_ready(noisy_linear_forward(xB, prepB, training=True))
    assert yB.shape == (24, 272)
    assert jnp.allclose(yB, noisy_linear_ref(xB, pB, True),
                        atol=2e-3, rtol=2e-3), "B train mismatch"
    yBe = jax.block_until_ready(noisy_linear_forward(xB, prepB, training=False))
    assert jnp.allclose(yBe, noisy_linear_ref(xB, pB, False),
                        atol=2e-3, rtol=2e-3), "B eval mismatch"

    # --- C: large batch -> fused path, multi-K, 2 N-blocks -------------------
    pC = init_noisy_linear(kp3, 2048, 256, sigma_init=0.5)
    prepC = prepare_noisy_linear_params(pC)
    xC = jax.random.normal(kx3, (192, 2048), dtype=jnp.float32)

    yC = jax.block_until_ready(noisy_linear_forward(xC, prepC, training=True))
    assert yC.shape == (192, 256)
    assert jnp.allclose(yC, noisy_linear_ref(xC, pC, True),
                        atol=2e-3, rtol=2e-3), "C train mismatch"
    yCe = jax.block_until_ready(noisy_linear_forward(xC, prepC, training=False))
    assert jnp.allclose(yCe, noisy_linear_ref(xC, pC, False),
                        atol=2e-3, rtol=2e-3), "C eval mismatch"

    # --- D: bf16 weight-storage path (looser tolerance) ----------------------
    prepA16 = prepare_noisy_linear_params(pA, weight_dtype=jnp.bfloat16)
    yD = jax.block_until_ready(noisy_linear_forward(xA, prepA16, training=True))
    assert jnp.allclose(yD, noisy_linear_ref(xA, pA, True),
                        atol=3e-2, rtol=3e-2), "D bf16 train mismatch"

    print("KERNEL_OK")
</pallas_src>

<mosaic_0001>
module attributes {stable_mosaic.version = 11 : i64} {
  func.func @_train_split_kernel(%arg0: i32, %arg1: i32, %arg2: i32, %arg3: memref<8x128xf32, #tpu.memory_space<vmem>>, %arg4: memref<128x128xf32, #tpu.memory_space<vmem>>, %arg5: memref<128x128xf32, #tpu.memory_space<vmem>>, %arg6: memref<1x128xf32, #tpu.memory_space<vmem>>, %arg7: memref<1x128xf32, #tpu.memory_space<vmem>>, %arg8: memref<1x128xf32, #tpu.memory_space<vmem>>, %arg9: memref<1x128xf32, #tpu.memory_space<vmem>>, %arg10: memref<1x128xf32, #tpu.memory_space<vmem>>, %arg11: memref<8x128xf32, #tpu.memory_space<vmem>>) attributes {dimension_semantics = [#tpu.dimension_semantics<parallel>, #tpu.dimension_semantics<parallel>, #tpu.dimension_semantics<arbitrary>], iteration_bounds = array<i64: 1, 1, 1>, scalar_prefetch = 0 : i64, scratch_operands = 0 : i64, tpu.core_type = #tpu.core_type<tc>, window_params = [{transform_indices = @transform_0, window_bounds = array<i64: 8, 128>}, {transform_indices = @transform_1, window_bounds = array<i64: 128, 128>}, {transform_indices = @transform_2, window_bounds = array<i64: 128, 128>}, {transform_indices = @transform_3, window_bounds = array<i64: 1, 128>}, {transform_indices = @transform_4, window_bounds = array<i64: 1, 128>}, {transform_indices = @transform_5, window_bounds = array<i64: 1, 128>}, {transform_indices = @transform_6, window_bounds = array<i64: 1, 128>}, {transform_indices = @transform_7, window_bounds = array<i64: 1, 128>}, {transform_indices = @transform_8, window_bounds = array<i64: 8, 128>}]} {
    %c0 = arith.constant 0 : index
    %c0_0 = arith.constant 0 : index
    %0 = vector.load %arg3[%c0, %c0_0] : memref<8x128xf32, #tpu.memory_space<vmem>>, vector<8x128xf32>
    %c0_1 = arith.constant 0 : index
    %c0_2 = arith.constant 0 : index
    %1 = vector.load %arg6[%c0_1, %c0_2] : memref<1x128xf32, #tpu.memory_space<vmem>>, vector<1x128xf32>
    %2 = vector.broadcast %1 : vector<1x128xf32> to vector<8x128xf32>
    %3 = arith.mulf %0, %2 : vector<8x128xf32>
    %c0_3 = arith.constant 0 : index
    %c0_4 = arith.constant 0 : index
    %4 = vector.load %arg4[%c0_3, %c0_4] : memref<128x128xf32, #tpu.memory_space<vmem>>, vector<128x128xf32>
    %cst = arith.constant dense<0.000000e+00> : vector<8x128xf32>
    %5 = tpu.matmul %0, %4, %cst {dimension_numbers = #tpu.dot_dimension_numbers<[1], [0], [0], [1], [0, 0, 1, 1], [], []>} : vector<8x128xf32>, vector<128x128xf32>, vector<8x128xf32> -> vector<8x128xf32>
    %c0_5 = arith.constant 0 : index
    %c0_6 = arith.constant 0 : index
    %6 = vector.load %arg5[%c0_5, %c0_6] : memref<128x128xf32, #tpu.memory_space<vmem>>, vector<128x128xf32>
    %cst_7 = arith.constant dense<0.000000e+00> : vector<8x128xf32>
    %7 = tpu.matmul %3, %6, %cst_7 {dimension_numbers = #tpu.dot_dimension_numbers<[1], [0], [0], [1], [0, 0, 1, 1], [], []>} : vector<8x128xf32>, vector<128x128xf32>, vector<8x128xf32> -> vector<8x128xf32>
    %c0_8 = arith.constant 0 : index
    %c0_9 = arith.constant 0 : index
    %8 = vector.load %arg8[%c0_8, %c0_9] : memref<1x128xf32, #tpu.memory_space<vmem>>, vector<1x128xf32>
    %c0_10 = arith.constant 0 : index
    %c0_11 = arith.constant 0 : index
    %9 = vector.load %arg9[%c0_10, %c0_11] : memref<1x128xf32, #tpu.memory_space<vmem>>, vector<1x128xf32>
    %c0_12 = arith.constant 0 : index
    %c0_13 = arith.constant 0 : index
    %10 = vector.load %arg10[%c0_12, %c0_13] : memref<1x128xf32, #tpu.memory_space<vmem>>, vector<1x128xf32>
    %11 = arith.mulf %9, %10 : vector<1x128xf32>
    %12 = arith.addf %8, %11 : vector<1x128xf32>
    %c0_14 = arith.constant 0 : index
    %c0_15 = arith.constant 0 : index
    %13 = vector.load %arg7[%c0_14, %c0_15] : memref<1x128xf32, #tpu.memory_space<vmem>>, vector<1x128xf32>
    %14 = vector.broadcast %13 : vector<1x128xf32> to vector<8x128xf32>
    %15 = arith.mulf %7, %14 : vector<8x128xf32>
    %16 = arith.addf %5, %15 : vector<8x128xf32>
    %17 = vector.broadcast %12 : vector<1x128xf32> to vector<8x128xf32>
    %18 = arith.addf %16, %17 : vector<8x128xf32>
    %c0_16 = arith.constant 0 : index
    %c0_17 = arith.constant 0 : index
    %19 = vector.load %arg11[%c0_16, %c0_17] : memref<8x128xf32, #tpu.memory_space<vmem>>, vector<8x128xf32>
    tpu.vector_store %arg11[%c0_16, %c0_17], %18 {strides = array<i32>} : memref<8x128xf32, #tpu.memory_space<vmem>>, vector<8x128xf32>,
    return
  }
  func.func @transform_0(%arg0: i32, %arg1: i32, %arg2: i32) -> (i32, i32) {
    %c0_i32 = arith.constant 0 : i32
    return %arg0, %arg2 : i32, i32
  }
  func.func @transform_1(%arg0: i32, %arg1: i32, %arg2: i32) -> (i32, i32) {
    %c0_i32 = arith.constant 0 : i32
    return %arg2, %arg1 : i32, i32
  }
  func.func @transform_2(%arg0: i32, %arg1: i32, %arg2: i32) -> (i32, i32) {
    %c0_i32 = arith.constant 0 : i32
    return %arg2, %arg1 : i32, i32
  }
  func.func @transform_3(%arg0: i32, %arg1: i32, %arg2: i32) -> (i32, i32) {
    %c0_i32 = arith.constant 0 : i32
    %c0_i32_0 = arith.constant 0 : i32
    return %c0_i32, %arg2 : i32, i32
  }
  func.func @transform_4(%arg0: i32, %arg1: i32, %arg2: i32) -> (i32, i32) {
    %c0_i32 = arith.constant 0 : i32
    %c0_i32_0 = arith.constant 0 : i32
    return %c0_i32, %arg1 : i32, i32
  }
  func.func @transform_5(%arg0: i32, %arg1: i32, %arg2: i32) -> (i32, i32) {
    %c0_i32 = arith.constant 0 : i32
    %c0_i32_0 = arith.constant 0 : i32
    return %c0_i32, %arg1 : i32, i32
  }
  func.func @transform_6(%arg0: i32, %arg1: i32, %arg2: i32) -> (i32, i32) {
    %c0_i32 = arith.constant 0 : i32
    %c0_i32_0 = arith.constant 0 : i32
    return %c0_i32, %arg1 : i32, i32
  }
  func.func @transform_7(%arg0: i32, %arg1: i32, %arg2: i32) -> (i32, i32) {
    %c0_i32 = arith.constant 0 : i32
    %c0_i32_0 = arith.constant 0 : i32
    return %c0_i32, %arg1 : i32, i32
  }
  func.func @transform_8(%arg0: i32, %arg1: i32, %arg2: i32) -> (i32, i32) {
    %c0_i32 = arith.constant 0 : i32
    return %arg0, %arg1 : i32, i32
  }
}

</mosaic_0001>

<bundles_post_ra>
// kernel: tpu_custom_call.1
= control target key start
LH: loop header
LB: loop body
LE: loop exit
PB: predicated region body
PF: predicated region fallthrough
CT: control target
= control target key end

     0   :  { %13 = vsyncpa [#allocation3], 0  ;;  %s601_s0 = inlined_call_operand.hbm [shape: f32[8,128], index: 0, kind: input, shape index: {}]   ;;  %s602_s1 = inlined_call_operand.hbm [shape: f32[128,128], index: 1, kind: input, shape index: {}]   ;;  %s603_s2 = inlined_call_operand.hbm [shape: f32[128,128], index: 2, kind: input, shape index: {}]   ;;  %s604_s3 = inlined_call_operand.vmem [shape: f32[1,128], index: 3, kind: input, shape index: {}]   ;;  %s605_s4 = inlined_call_operand.vmem [shape: f32[1,128], index: 4, kind: input, shape index: {}]   ;;  %s606_s5 = inlined_call_operand.vmem [shape: f32[1,128], index: 5, kind: input, shape index: {}]   ;;  %s607_s6 = inlined_call_operand.vmem [shape: f32[1,128], index: 6, kind: input, shape index: {}]   ;;  %s608_s7 = inlined_call_operand.vmem [shape: f32[1,128], index: 7, kind: input, shape index: {}]   ;;  %s609_s8 = inlined_call_operand.hbm [shape: f32[8,128], index: 8, kind: output, shape index: {}]  }
   0x1   :  { %14 = vsyncpa [#allocation6], 0 }
   0x2   :  { %15 = vsyncpa [#allocation4], 0  ;;  %s487_s27 = smov [#allocation5]  }
   0x3   :  { %s31_s28 = sshll.u32 %s487_s27, 4  ;;  %s32_s28 = int_to_ptr.vmem [resolvable:$true] %s31_s28 }
   0x4   :  { %s409_s29 = scalar_lea.vmem %s32_s28, 2048  ;;  %p414_p1 = scmp.lt.s32.totalorder %s32_s28, %s32_s28 }
   0x5   :  { %p410_p0 = scmp.ne.s32.totalorder %s32_s28, %s409_s29  ;;  %p415_p2 = scmp.lt.s32.totalorder %s409_s29, %s409_s29 }
   0x7   :  { %p416_p3 = por %p415_p2, %p414_p1 }
   0x9   :  { %p417_p4 = pnand %p416_p3, %p410_p0 }
   0xb   :  { %420 = shalt.err (!%p417_p4)
}
   0xc   :  { %s488_s30 = smov 128   ;;  %s489_s9 = smov 8  }
   0xd   :  { %37 = dma.hbm_to_vmem [thread:$0]  %s602_s1, 2048, %s32_s28, [#allocation6], %s488_s30, %s488_s30, %s489_s9  }
   0xe   :  { %s490_s12 = smov [#allocation2]   ;;  %s491_s14 = smov [#allocation7]  }
   0xf   :  { %s22_s13 = sshll.u32 %s490_s12, 4  ;;  %s43_s15 = sshll.u32 %s491_s14, 4  ;;  %s23_s13 = int_to_ptr.vmem [resolvable:$true] %s22_s13  ;;  %s44_s15 = int_to_ptr.vmem [resolvable:$true] %s43_s15 }
  0x10   :  { %s429_s16 = scalar_lea.vmem %s23_s13, 128  ;;  %p434_p6 = scmp.lt.s32.totalorder %s23_s13, %s23_s13 }
  0x11   :  { %p430_p5 = scmp.ne.s32.totalorder %s23_s13, %s429_s16  ;;  %p435_p7 = scmp.lt.s32.totalorder %s429_s16, %s429_s16 }
  0x13   :  { %p436_p8 = por %p435_p7, %p434_p6 }
  0x15   :  { %p437_p9 = pnand %p436_p8, %p430_p5 }
  0x17   :  { %440 = shalt.err (!%p437_p9)
}
  0x18   :  { %25 = dma.hbm_to_vmem [thread:$0]  %s601_s0, 128, %s23_s13, [#allocation3]  }
  0x19   :  { %s449_s19 = scalar_lea.vmem %s44_s15, 2048  ;;  %p454_p11 = scmp.lt.s32.totalorder %s44_s15, %s44_s15 }
  0x1a   :  { %p450_p10 = scmp.ne.s32.totalorder %s44_s15, %s449_s19  ;;  %p455_p12 = scmp.lt.s32.totalorder %s449_s19, %s449_s19 }
  0x1c   :  { %p456_p13 = por %p455_p12, %p454_p11 }
  0x1e   :  { %p457_p0 = pnand %p456_p13, %p450_p10 }
  0x20   :  { %460 = shalt.err (!%p457_p0)
}
  0x21   :  { %49 = dma.hbm_to_vmem [thread:$0]  %s603_s2, 2048, %s44_s15, [#allocation6], %s488_s30, %s488_s30, %s489_s9  }
  0x22   :  { %481 = dma.done.wait [#allocation3], 128  }
  0x23   :  { %482 = vsyncadd [#allocation3], 4294967168 }
  0x24   :  { %483 = dma.done.wait [#allocation6], 4096  }
  0x25   :  { %484 = vsyncadd [#allocation6], 4294963200  ;;  %v492_v0 = vmov 0.0   ;;  %vm493_vm0 = vmmov 0   ;;  %v109_v1 = vld [vmem:[#allocation7 + $0x78] sm:$0xff]  ;;  %v108_v3 = vld [vmem:[#allocation7 + $0x70] sm:$0xff]  ;;  %v264_v36 = vlaneseq }
  0x26   :  { %323 = vmatprep.subr.mxu0 %v492_v0  ;;  %358 = vmatprep.subr.mxu1 %v492_v0  ;;  %v93_v2 = vld [vmem:[#allocation5 + $0x78] sm:$0xff]  ;;  %v92_v4 = vld [vmem:[#allocation5 + $0x70] sm:$0xff]  ;;  %v107_v5 = vld [vmem:[#allocation7 + $0x68] sm:$0xff] }
  0x27   :  { %355 = vmatprep.mubr.msk.f32.mxu0 %vm493_vm0, %v492_v0  ;;  %390 = vmatprep.mubr.msk.f32.mxu1 %vm493_vm0, %v492_v0  ;;  %v91_v6 = vld [vmem:[#allocation5 + $0x68] sm:$0xff]  ;;  %v106_v7 = vld [vmem:[#allocation7 + $0x60] sm:$0xff]  ;;  %v105_v9 = vld [vmem:[#allocation7 + $0x58] sm:$0xff]  ;;  %v265_v40 = vshrl.u32 %v264_v36, 7 }
  0x28   :  { %324 = vmatpush3.msra.mxu0 %v109_v1  ;;  %359 = vmatpush3.msra.mxu1 %v93_v2  ;;  %v90_v8 = vld [vmem:[#allocation5 + $0x60] sm:$0xff]  ;;  %v89_v10 = vld [vmem:[#allocation5 + $0x58] sm:$0xff]  ;;  %v104_v11 = vld [vmem:[#allocation7 + $0x50] sm:$0xff] }
  0x29   :  { %325 = vmatprep.subr.mxu0 %v492_v0  ;;  %360 = vmatprep.subr.mxu1 %v492_v0  ;;  %v88_v12 = vld [vmem:[#allocation5 + $0x50] sm:$0xff]  ;;  %v103_v13 = vld [vmem:[#allocation7 + $0x48] sm:$0xff]  ;;  %v102_v15 = vld [vmem:[#allocation7 + $0x40] sm:$0xff]  ;;  %v266_v43 = vsub.s32 0, %v265_v40 }
  0x2a   :  { %326 = vmatpush3.msra.mxu0 %v108_v3  ;;  %361 = vmatpush3.msra.mxu1 %v92_v4  ;;  %v87_v14 = vld [vmem:[#allocation5 + $0x48] sm:$0xff]  ;;  %v86_v16 = vld [vmem:[#allocation5 + $0x40] sm:$0xff]  ;;  %v101_v17 = vld [vmem:[#allocation7 + $0x38] sm:$0xff] }
  0x2b   :  { %327 = vmatprep.subr.mxu0 %v492_v0  ;;  %362 = vmatprep.subr.mxu1 %v492_v0  ;;  %v85_v18 = vld [vmem:[#allocation5 + $0x38] sm:$0xff]  ;;  %v100_v19 = vld [vmem:[#allocation7 + $0x30] sm:$0xff]  ;;  %v99_v21 = vld [vmem:[#allocation7 + $0x28] sm:$0xff] }
  0x2c   :  { %328 = vmatpush3.msra.mxu0 %v107_v5  ;;  %363 = vmatpush3.msra.mxu1 %v91_v6  ;;  %v84_v20 = vld [vmem:[#allocation5 + $0x30] sm:$0xff]  ;;  %v83_v22 = vld [vmem:[#allocation5 + $0x28] sm:$0xff]  ;;  %v98_v23 = vld [vmem:[#allocation7 + $0x20] sm:$0xff] }
  0x2d   :  { %329 = vmatprep.subr.mxu0 %v492_v0  ;;  %364 = vmatprep.subr.mxu1 %v492_v0  ;;  %v82_v24 = vld [vmem:[#allocation5 + $0x20] sm:$0xff]  ;;  %v97_v25 = vld [vmem:[#allocation7 + $0x18] sm:$0xff]  ;;  %v96_v27 = vld [vmem:[#allocation7 + $0x10] sm:$0xff] }
  0x2e   :  { %330 = vmatpush3.msra.mxu0 %v106_v7  ;;  %365 = vmatpush3.msra.mxu1 %v90_v8  ;;  %v81_v26 = vld [vmem:[#allocation5 + $0x18] sm:$0xff]  ;;  %v80_v28 = vld [vmem:[#allocation5 + $0x10] sm:$0xff]  ;;  %v95_v31 = vld [vmem:[#allocation7 + $0x8] sm:$0xff] }
  0x2f   :  { %331 = vmatprep.subr.mxu0 %v492_v0  ;;  %366 = vmatprep.subr.mxu1 %v492_v0  ;;  %v69_v29 = vld [vmem:[#allocation2] sm:$0xff]  ;;  %v79_v32 = vld [vmem:[#allocation5 + $0x8] sm:$0xff]  ;;  %v94_v33 = vld [vmem:[#allocation7] sm:$0xff] }
  0x30   :  { %332 = vmatpush3.msra.mxu0 %v105_v9  ;;  %367 = vmatpush3.msra.mxu1 %v89_v10  ;;  %v287_v30 = vld [vmem:[%s604_s3] ss:$0 sm:$0xff]  ;;  %v78_v34 = vld [vmem:[#allocation5] sm:$0xff] }
  0x31   :  { %333 = vmatprep.subr.mxu0 %v492_v0  ;;  %368 = vmatprep.subr.mxu1 %v492_v0  ;;  %v77_v35 = vmul.f32 %v287_v30, %v69_v29  ;;  %v181_v37 = vld [vmem:[%s607_s6] sm:$0x1]  ;;  %s494_s6 = smov [#allocation8]  }
  0x32   :  { %334 = vmatpush3.msra.mxu0 %v104_v11  ;;  %369 = vmatpush3.msra.mxu1 %v88_v12  ;;  %v182_v38 = vld [vmem:[%s608_s7] sm:$0x1]  ;;  %s277_s7 = sshll.u32 %s494_s6, 4  ;;  %s278_s7 = int_to_ptr.vmem [resolvable:$true] %s277_s7 }
  0x33   :  { %335 = vmatprep.subr.mxu0 %v492_v0  ;;  %370 = vmatprep.subr.mxu1 %v492_v0  ;;  %v183_v39 = vmul.f32 %v182_v38, %v181_v37  ;;  %v180_v41 = vld [vmem:[%s606_s5] sm:$0x1]  ;;  %s461_s28 = scalar_lea.vmem %s278_s7, 128  ;;  %p466_p2 = scmp.lt.s32.totalorder %s278_s7, %s278_s7 }
  0x34   :  { %336 = vmatpush3.msra.mxu0 %v103_v13  ;;  %371 = vmatpush3.msra.mxu1 %v87_v14  ;;  %v288_v44 = vld [vmem:[%s605_s4] ss:$0 sm:$0xff]  ;;  %p462_p1 = scmp.ne.s32.totalorder %s278_s7, %s461_s28  ;;  %p467_p3 = scmp.lt.s32.totalorder %s461_s28, %s461_s28 }
  0x35   :  { %337 = vmatprep.subr.mxu0 %v492_v0  ;;  %372 = vmatprep.subr.mxu1 %v492_v0  ;;  %v184_v42 = vadd.f32 %v183_v39, %v180_v41 }
  0x36   :  { %338 = vmatpush3.msra.mxu0 %v102_v15  ;;  %373 = vmatpush3.msra.mxu1 %v86_v16  ;;  %p468_p4 = por %p467_p3, %p466_p2 }
  0x37   :  { %339 = vmatprep.subr.mxu0 %v492_v0  ;;  %374 = vmatprep.subr.mxu1 %v492_v0  ;;  %v267_v48 = vrot.slane %v184_v42, %v266_v43 }
  0x38   :  { %340 = vmatpush3.msra.mxu0 %v101_v17  ;;  %375 = vmatpush3.msra.mxu1 %v85_v18  ;;  %p469_p5 = pnand %p468_p4, %p462_p1 }
  0x39   :  { %341 = vmatprep.subr.mxu0 %v492_v0  ;;  %376 = vmatprep.subr.mxu1 %v492_v0 }
  0x3a   :  { %342 = vmatpush3.msra.mxu0 %v100_v19  ;;  %377 = vmatpush3.msra.mxu1 %v84_v20 }
  0x3b   :  { %343 = vmatprep.subr.mxu0 %v492_v0  ;;  %378 = vmatprep.subr.mxu1 %v492_v0 }
  0x3c   :  { %344 = vmatpush3.msra.mxu0 %v99_v21  ;;  %379 = vmatpush3.msra.mxu1 %v83_v22 }
  0x3d   :  { %345 = vmatprep.subr.mxu0 %v492_v0  ;;  %380 = vmatprep.subr.mxu1 %v492_v0 }
  0x3e   :  { %346 = vmatpush3.msra.mxu0 %v98_v23  ;;  %381 = vmatpush3.msra.mxu1 %v82_v24 }
  0x3f   :  { %347 = vmatprep.subr.mxu0 %v492_v0  ;;  %382 = vmatprep.subr.mxu1 %v492_v0 }
  0x40   :  { %348 = vmatpush3.msra.mxu0 %v97_v25  ;;  %383 = vmatpush3.msra.mxu1 %v81_v26 }
  0x41   :  { %349 = vmatprep.subr.mxu0 %v492_v0  ;;  %384 = vmatprep.subr.mxu1 %v492_v0 }
  0x42   :  { %350 = vmatpush3.msra.mxu0 %v96_v27  ;;  %385 = vmatpush3.msra.mxu1 %v80_v28 }
  0x43   :  { %351 = vmatprep.subr.mxu0 %v492_v0  ;;  %386 = vmatprep.subr.mxu1 %v492_v0 }
  0x44   :  { %352 = vmatpush3.msra.mxu0 %v95_v31  ;;  %387 = vmatpush3.msra.mxu1 %v79_v32 }
  0x45   :  { %353 = vmatprep.subr.mxu0 %v492_v0  ;;  %388 = vmatprep.subr.mxu1 %v492_v0 }
  0x46   :  { %354 = vmatpush3.msra.mxu0 %v94_v33  ;;  %389 = vmatpush3.msra.mxu1 %v78_v34 }
  0x47   :  { %356 = vmatmul.mubr.f32.vlgmr.msra.gmra.mxu0 %v77_v35  ;;  %391 = vmatmul.mubr.f32.vlgmr.msra.gmra.mxu1 %v69_v29 }
 0x107   :  { %v176_v45 = vpop.f32.mrf.mxu0  ;;  %v259_v46 = vpop.f32.mrf.mxu1 }
 0x108   :  { %v192_v47 = vmul.f32 %v288_v44, %v176_v45 }
 0x109   :  { %v357_v49 = vpop.f32.mrf.mxu0  ;;  %v392_v50 = vpop.f32.mrf.mxu1 }
 0x10a   :  { %v260_v51 = vadd.f32 %v259_v46, %v192_v47 }
 0x10c   :  { %v269_v52 = vadd.f32 %v267_v48, %v260_v51 }
 0x10e   :  { %270 = vst [vmem:[#allocation8] sm:$0xff] %v269_v52 }
 0x10f   :  { %472 = shalt.err (!%p469_p5)
}
 0x110   :  { %280 = dma.vmem_to_hbm [thread:$0]  %s278_s7, 128, %s609_s8, [#allocation4]  }
 0x111   :  { %485 = dma.done.wait [#allocation4], 128  }
 0x112   :  { %486 = vsyncadd [#allocation4], 4294967168 }
 0x113   :  { %284 = vsyncpa [#allocation3], 1 }
 0x114   :  { %285 = vsyncpa [#allocation6], 1 }
 0x115   :  { %286 = vsyncpa [#allocation4], 1 }

</bundles_post_ra>
